<compile_context>
chip_gen: v6e
topology: v6e:2x2x1
jax: 0.10.0
libtpu: 0.0.40
codegen_flags: <defaults>
</compile_context>

<pallas_src>
import numpy as np
import jax
import jax.numpy as jnp
from jax.experimental import pallas as pl
from jax.experimental.pallas import tpu as pltpu

# Default problem sizes (len(features) is unknown from the reference; pick 4).
B, L, F = 2, 12, 4          # batch, window_size, number of input features
C, KS, H = 16, 3, 100       # conv out channels, conv kernel size, fc1 hidden


def _round_up(n, m):
    return ((n + m - 1) // m) * m


# --------------------------------------------------------------------------
# Kernel: two MXU matmuls over a batch tile + f32 VPU/XLU epilogue.
# --------------------------------------------------------------------------
def mfcnn_kernel(x_ref, wc_ref, bc_ref, w1_ref, b1_ref, w2_ref, b2_ref,
                 out_ref):
    # x_ref : (TM, DIN)      bf16 time-major flattened input rows
    # wc_ref: (DIN, DMID)    bf16 Conv1d(pad=1) folded into a dense matrix
    # bc_ref: (1, DMID)      f32 conv bias tiled per timestep
    # w1_ref: (DMID, H_P)    bf16 fc1 weight, re-indexed to time-major flatten
    # b1_ref: (1, H_P)       f32
    # w2_ref: (1, H_P)       f32 fc2 weight as a single broadcast row
    # b2_ref: (1,)           f32 scalar in SMEM
    # out_ref: (TM, 1)
    conv = jnp.dot(x_ref[...], wc_ref[...],
                   preferred_element_type=jnp.float32)            # (TM, DMID) f32
    conv = jnp.maximum(conv + bc_ref[...], 0.0)                   # bias + ReLU (f32)
    h1 = jnp.dot(conv.astype(jnp.bfloat16), w1_ref[...],
                 preferred_element_type=jnp.float32)              # (TM, H_P) f32
    h1 = jnp.maximum(h1 + b1_ref[...], 0.0)                       # bias + ReLU (f32)
    # fc2 on the VPU/XLU: broadcast multiply + lane reduce (no 1-lane matmul)
    out_ref[...] = (jnp.sum(h1 * w2_ref[...], axis=-1, keepdims=True)
                    + b2_ref[0])


# --------------------------------------------------------------------------
# One-time (host-side, numpy) fold of PyTorch-shaped params into the kernel's
# dense, padded layout.  Call ONCE and reuse — not part of the per-call path.
# --------------------------------------------------------------------------
def fold_params(conv_w, conv_b, fc1_w, fc1_b, fc2_w, fc2_b, window_size):
    conv_w = np.asarray(conv_w, np.float32)        # (C, F, KS)
    conv_b = np.asarray(conv_b, np.float32)        # (C,)
    fc1_w = np.asarray(fc1_w, np.float32)          # (H, C*L)
    fc1_b = np.asarray(fc1_b, np.float32)          # (H,)
    fc2_w = np.asarray(fc2_w, np.float32)          # (1, H)
    fc2_b = np.asarray(fc2_b, np.float32)          # (1,)

    c, f, ks = conv_w.shape
    l = window_size
    h = fc1_w.shape[0]
    assert ks % 2 == 1, "conv fold assumes odd kernel_size with padding=ks//2"
    pad = ks // 2
    din, dmid = l * f, l * c
    h_p = _round_up(h, 128)

    # Conv1d(padding=pad) as one dense (din, dmid) matrix on time-major flats:
    #   pre[b, t*C + c] = sum_{k,f} x[b, t+k-pad, f] * conv_w[c, f, k]
    wd = np.zeros((din, dmid), np.float32)
    for k in range(ks):
        blk = conv_w[:, :, k].T                    # (F, C)
        for t in range(l):
            tp = t + k - pad
            if 0 <= tp < l:
                wd[tp * f:(tp + 1) * f, t * c:(t + 1) * c] = blk
    bc = np.tile(conv_b, l)[None, :]               # (1, dmid)

    # fc1: PyTorch flattens (B, C, L) channel-major (index c*L + t); the kernel
    # flatten is time-major (index t*C + c) -> re-index fc1_w.
    w1_tm = np.transpose(fc1_w.reshape(h, c, l), (2, 1, 0)).reshape(dmid, h)
    w1 = np.zeros((dmid, h_p), np.float32)
    w1[:, :h] = w1_tm
    b1 = np.zeros((1, h_p), np.float32)
    b1[0, :h] = fc1_b

    w2 = np.zeros((1, h_p), np.float32)
    w2[0, :h] = fc2_w[0]
    b2 = fc2_b.reshape(1)

    return (jnp.asarray(wd, jnp.bfloat16),      # MXU operand -> bf16
            jnp.asarray(bc, jnp.float32),
            jnp.asarray(w1, jnp.bfloat16),      # MXU operand -> bf16
            jnp.asarray(b1, jnp.float32),
            jnp.asarray(w2, jnp.float32),       # VPU operand -> keep f32
            jnp.asarray(b2, jnp.float32))


# --------------------------------------------------------------------------
# Per-call wrapper: flatten activation, launch pallas_call with a batch grid.
# --------------------------------------------------------------------------
def multi_feature_cnn(x, folded):
    wd, bc, w1, b1, w2, b2 = folded
    b, l, f = x.shape
    din, dmid = wd.shape
    h_p = w1.shape[1]
    assert din == l * f, "input window/feature sizes do not match folded params"

    # Batch tile: 128 rows per grid step when the batch is large (amortizes the
    # per-step overhead and shards across both v7x TCs); otherwise one step.
    b8 = _round_up(b, 8)
    tm = 128 if b8 >= 128 else b8
    b_pad = _round_up(b, tm)
    grid = (b_pad // tm,)

    # Per-call activation prep: flatten, cast to bf16, zero-pad batch rows.
    x_flat = jnp.zeros((b_pad, din), jnp.bfloat16).at[:b, :].set(
        x.reshape(b, din).astype(jnp.bfloat16))

    out = pl.pallas_call(
        mfcnn_kernel,
        out_shape=jax.ShapeDtypeStruct((b_pad, 1), jnp.float32),
        grid=grid,
        in_specs=[
            pl.BlockSpec((tm, din), lambda i: (i, 0)),     # x rows (pipelined)
            pl.BlockSpec((din, dmid), lambda i: (0, 0)),   # wd (resident)
            pl.BlockSpec((1, dmid), lambda i: (0, 0)),     # bc
            pl.BlockSpec((dmid, h_p), lambda i: (0, 0)),   # w1 (resident)
            pl.BlockSpec((1, h_p), lambda i: (0, 0)),      # b1
            pl.BlockSpec((1, h_p), lambda i: (0, 0)),      # w2
            pl.BlockSpec(memory_space=pltpu.MemorySpace.SMEM),   # b2 scalar
        ],
        out_specs=pl.BlockSpec((tm, 1), lambda i: (i, 0)),
        compiler_params=pltpu.CompilerParams(
            dimension_semantics=("parallel",)),
    )(x_flat, wd, bc, w1, b1, w2, b2)
    return out[:b]


# --------------------------------------------------------------------------
# Plain-JAX (f32) re-implementation of the PyTorch forward, for verification.
# --------------------------------------------------------------------------
def reference(x, conv_w, conv_b, fc1_w, fc1_b, fc2_w, fc2_b):
    b, l, f = x.shape
    c, _, ks = conv_w.shape
    xt = jnp.transpose(x, (0, 2, 1))                      # (B, F, L)
    xp = jnp.pad(xt, ((0, 0), (0, 0), (1, 1)))
    conv = jnp.zeros((b, c, l), jnp.float32)
    for t in range(l):
        patch = xp[:, :, t:t + ks]                        # (B, F, KS)
        conv = conv.at[:, :, t].set(
            jnp.einsum('bfk,ofk->bo', patch, conv_w) + conv_b)
    conv = jnp.maximum(conv, 0.0)
    flat = conv.reshape(b, -1)                            # channel-major flatten
    h1 = jnp.maximum(flat @ fc1_w.T + fc1_b, 0.0)
    return h1 @ fc2_w.T + fc2_b


if __name__ == "__main__":
    key = jax.random.PRNGKey(0)
    ks_ = jax.random.split(key, 7)
    x      = jax.random.normal(ks_[0], (B, L, F), jnp.float32)
    conv_w = jax.random.normal(ks_[1], (C, F, KS), jnp.float32) * 0.2
    conv_b = jax.random.normal(ks_[2], (C,), jnp.float32) * 0.1
    fc1_w  = jax.random.normal(ks_[3], (H, C * L), jnp.float32) * 0.05
    fc1_b  = jax.random.normal(ks_[4], (H,), jnp.float32) * 0.05
    fc2_w  = jax.random.normal(ks_[5], (1, H), jnp.float32) * 0.05
    fc2_b  = jax.random.normal(ks_[6], (1,), jnp.float32) * 0.05

    # One-time weight fold (host side) -- reused across forward calls.
    folded = fold_params(conv_w, conv_b, fc1_w, fc1_b, fc2_w, fc2_b, L)

    out = multi_feature_cnn(x, folded)
    out = jax.block_until_ready(out)

    ref = reference(x, conv_w, conv_b, fc1_w, fc1_b, fc2_w, fc2_b)
    assert out.shape == (B, 1), out.shape
    # bf16 MXU operands (f32 accumulation/epilogue) -> slightly looser tolerance
    assert jnp.allclose(out, ref, rtol=2e-2, atol=2e-2), (out, ref)
    print("KERNEL_OK")
</pallas_src>

<mosaic_0001>
module attributes {stable_mosaic.version = 11 : i64} {
  func.func @mfcnn_kernel(%arg0: i32, %arg1: memref<8x48xbf16, #tpu.memory_space<vmem>>, %arg2: memref<48x192xbf16, #tpu.memory_space<vmem>>, %arg3: memref<1x192xf32, #tpu.memory_space<vmem>>, %arg4: memref<192x128xbf16, #tpu.memory_space<vmem>>, %arg5: memref<1x128xf32, #tpu.memory_space<vmem>>, %arg6: memref<1x128xf32, #tpu.memory_space<vmem>>, %arg7: memref<1xf32, #tpu.memory_space<smem>>, %arg8: memref<8x1xf32, #tpu.memory_space<vmem>>) attributes {dimension_semantics = [#tpu.dimension_semantics<parallel>], iteration_bounds = array<i64: 1>, scalar_prefetch = 0 : i64, scratch_operands = 0 : i64, tpu.core_type = #tpu.core_type<tc>, window_params = [{transform_indices = @transform_0, window_bounds = array<i64: 8, 48>}, {pipeline_mode = #tpu.pipeline_mode<synchronous>, transform_indices = @transform_1, window_bounds = array<i64: 48, 192>}, {pipeline_mode = #tpu.pipeline_mode<synchronous>, transform_indices = @transform_2, window_bounds = array<i64: 1, 192>}, {pipeline_mode = #tpu.pipeline_mode<synchronous>, transform_indices = @transform_3, window_bounds = array<i64: 192, 128>}, {pipeline_mode = #tpu.pipeline_mode<synchronous>, transform_indices = @transform_4, window_bounds = array<i64: 1, 128>}, {pipeline_mode = #tpu.pipeline_mode<synchronous>, transform_indices = @transform_5, window_bounds = array<i64: 1, 128>}, {transform_indices = @transform_6, window_bounds = array<i64: 1>}, {transform_indices = @transform_7, window_bounds = array<i64: 8, 1>}]} {
    %c0 = arith.constant 0 : index
    %c0_0 = arith.constant 0 : index
    %0 = vector.load %arg1[%c0, %c0_0] : memref<8x48xbf16, #tpu.memory_space<vmem>>, vector<8x48xbf16>
    %c0_1 = arith.constant 0 : index
    %c0_2 = arith.constant 0 : index
    %1 = vector.load %arg2[%c0_1, %c0_2] : memref<48x192xbf16, #tpu.memory_space<vmem>>, vector<48x192xbf16>
    %cst = arith.constant dense<0.000000e+00> : vector<8x192xf32>
    %2 = tpu.matmul %0, %1, %cst {dimension_numbers = #tpu.dot_dimension_numbers<[1], [0], [0], [1], [0, 0, 1, 1], [], []>} : vector<8x48xbf16>, vector<48x192xbf16>, vector<8x192xf32> -> vector<8x192xf32>
    %c0_3 = arith.constant 0 : index
    %c0_4 = arith.constant 0 : index
    %3 = vector.load %arg3[%c0_3, %c0_4] : memref<1x192xf32, #tpu.memory_space<vmem>>, vector<1x192xf32>
    %4 = vector.broadcast %3 : vector<1x192xf32> to vector<8x192xf32>
    %5 = arith.addf %2, %4 : vector<8x192xf32>
    %cst_5 = arith.constant 0.000000e+00 : f32
    %6 = vector.broadcast %cst_5 : f32 to vector<8x192xf32>
    %7 = arith.maximumf %5, %6 : vector<8x192xf32>
    %8 = arith.truncf %7 : vector<8x192xf32> to vector<8x192xbf16>
    %c0_6 = arith.constant 0 : index
    %c0_7 = arith.constant 0 : index
    %9 = vector.load %arg4[%c0_6, %c0_7] : memref<192x128xbf16, #tpu.memory_space<vmem>>, vector<192x128xbf16>
    %cst_8 = arith.constant dense<0.000000e+00> : vector<8x128xf32>
    %10 = tpu.matmul %8, %9, %cst_8 {dimension_numbers = #tpu.dot_dimension_numbers<[1], [0], [0], [1], [0, 0, 1, 1], [], []>} : vector<8x192xbf16>, vector<192x128xbf16>, vector<8x128xf32> -> vector<8x128xf32>
    %c0_9 = arith.constant 0 : index
    %c0_10 = arith.constant 0 : index
    %11 = vector.load %arg5[%c0_9, %c0_10] : memref<1x128xf32, #tpu.memory_space<vmem>>, vector<1x128xf32>
    %12 = vector.broadcast %11 : vector<1x128xf32> to vector<8x128xf32>
    %13 = arith.addf %10, %12 : vector<8x128xf32>
    %cst_11 = arith.constant 0.000000e+00 : f32
    %14 = vector.broadcast %cst_11 : f32 to vector<8x128xf32>
    %15 = arith.maximumf %13, %14 : vector<8x128xf32>
    %c0_12 = arith.constant 0 : index
    %c0_13 = arith.constant 0 : index
    %16 = vector.load %arg6[%c0_12, %c0_13] : memref<1x128xf32, #tpu.memory_space<vmem>>, vector<1x128xf32>
    %17 = vector.broadcast %16 : vector<1x128xf32> to vector<8x128xf32>
    %18 = arith.mulf %15, %17 : vector<8x128xf32>
    %cst_14 = arith.constant dense<0.000000e+00> : vector<8xf32>
    %19 = vector.multi_reduction <add>, %18, %cst_14 [1] : vector<8x128xf32> to vector<8xf32>
    %20 = vector.shape_cast %19 : vector<8xf32> to vector<8x1xf32>
    %c0_15 = arith.constant 0 : index
    %21 = memref.load %arg7[%c0_15] : memref<1xf32, #tpu.memory_space<smem>>
    %22 = vector.broadcast %21 : f32 to vector<8x1xf32>
    %23 = arith.addf %20, %22 : vector<8x1xf32>
    %c0_16 = arith.constant 0 : index
    %c0_17 = arith.constant 0 : index
    %24 = vector.load %arg8[%c0_16, %c0_17] : memref<8x1xf32, #tpu.memory_space<vmem>>, vector<8x1xf32>
    tpu.vector_store %arg8[%c0_16, %c0_17], %23 {strides = array<i32>} : memref<8x1xf32, #tpu.memory_space<vmem>>, vector<8x1xf32>,
    return
  }
  func.func @transform_0(%arg0: i32) -> (i32, i32) {
    %c0_i32 = arith.constant 0 : i32
    %c0_i32_0 = arith.constant 0 : i32
    return %arg0, %c0_i32 : i32, i32
  }
  func.func @transform_1(%arg0: i32) -> (i32, i32) {
    %c0_i32 = arith.constant 0 : i32
    %c0_i32_0 = arith.constant 0 : i32
    %c0_i32_1 = arith.constant 0 : i32
    return %c0_i32, %c0_i32_0 : i32, i32
  }
  func.func @transform_2(%arg0: i32) -> (i32, i32) {
    %c0_i32 = arith.constant 0 : i32
    %c0_i32_0 = arith.constant 0 : i32
    %c0_i32_1 = arith.constant 0 : i32
    return %c0_i32, %c0_i32_0 : i32, i32
  }
  func.func @transform_3(%arg0: i32) -> (i32, i32) {
    %c0_i32 = arith.constant 0 : i32
    %c0_i32_0 = arith.constant 0 : i32
    %c0_i32_1 = arith.constant 0 : i32
    return %c0_i32, %c0_i32_0 : i32, i32
  }
  func.func @transform_4(%arg0: i32) -> (i32, i32) {
    %c0_i32 = arith.constant 0 : i32
    %c0_i32_0 = arith.constant 0 : i32
    %c0_i32_1 = arith.constant 0 : i32
    return %c0_i32, %c0_i32_0 : i32, i32
  }
  func.func @transform_5(%arg0: i32) -> (i32, i32) {
    %c0_i32 = arith.constant 0 : i32
    %c0_i32_0 = arith.constant 0 : i32
    %c0_i32_1 = arith.constant 0 : i32
    return %c0_i32, %c0_i32_0 : i32, i32
  }
  func.func @transform_6(%arg0: i32) -> i32 {
    %c0_i32 = arith.constant 0 : i32
    %c0_i32_0 = arith.constant 0 : i32
    return %c0_i32 : i32
  }
  func.func @transform_7(%arg0: i32) -> (i32, i32) {
    %c0_i32 = arith.constant 0 : i32
    %c0_i32_0 = arith.constant 0 : i32
    return %arg0, %c0_i32 : i32, i32
  }
}

</mosaic_0001>

<bundles_post_ra>
// kernel: tpu_custom_call.1
= control target key start
LH: loop header
LB: loop body
LE: loop exit
PB: predicated region body
PF: predicated region fallthrough
CT: control target
= control target key end

     0   :  { %13 = vsyncpa [#allocation4], 0  ;;  %s521_s0 = inlined_call_operand.hbm [shape: bf16[8,48], index: 0, kind: input, shape index: {}]   ;;  %s522_s1 = inlined_call_operand.hbm [shape: bf16[48,192], index: 1, kind: input, shape index: {}]   ;;  %s523_s2 = inlined_call_operand.vmem [shape: f32[1,192], index: 2, kind: input, shape index: {}]   ;;  %s524_s3 = inlined_call_operand.hbm [shape: bf16[192,128], index: 3, kind: input, shape index: {}]   ;;  %s525_s4 = inlined_call_operand.vmem [shape: f32[1,128], index: 4, kind: input, shape index: {}]   ;;  %s526_s5 = inlined_call_operand.vmem [shape: f32[1,128], index: 5, kind: input, shape index: {}]   ;;  %s527_s6 = inlined_call_operand.<no memory space> [shape: f32[1], index: 6, kind: input, shape index: {}]   ;;  %s528_s7 = inlined_call_operand.vmem [shape: f32[8,1], index: 7, kind: output, shape index: {}]  }
   0x1   :  { %14 = vsyncpa [#allocation6], 0  ;;  %s449_s24 = smov [#allocation5]  }
   0x2   :  { %s30_s25 = sshll.u32 %s449_s24, 4  ;;  %s31_s25 = int_to_ptr.vmem [resolvable:$true] %s30_s25 }
   0x3   :  { %s393_s26 = scalar_lea.vmem %s31_s25, 768  ;;  %p398_p1 = scmp.lt.s32.totalorder %s31_s25, %s31_s25 }
   0x4   :  { %p394_p0 = scmp.ne.s32.totalorder %s31_s25, %s393_s26  ;;  %p399_p2 = scmp.lt.s32.totalorder %s393_s26, %s393_s26 }
   0x6   :  { %p400_p3 = por %p399_p2, %p398_p1 }
   0x8   :  { %p401_p4 = pnand %p400_p3, %p394_p0 }
   0xa   :  { %404 = shalt.err (!%p401_p4)
}
   0xb   :  { %s450_s27 = smov 128   ;;  %s451_s28 = smov 8  }
   0xc   :  { %36 = dma.hbm_to_vmem [thread:$0]  %s522_s1, 768, %s31_s25, [#allocation6], %s450_s27, %s450_s27, %s451_s28  }
   0xd   :  { %s452_s8 = smov [#allocation3]   ;;  %s453_s10 = smov [#allocation7]  }
   0xe   :  { %s21_s9 = sshll.u32 %s452_s8, 4  ;;  %s44_s11 = sshll.u32 %s453_s10, 4  ;;  %s22_s9 = int_to_ptr.vmem [resolvable:$true] %s21_s9  ;;  %s45_s11 = int_to_ptr.vmem [resolvable:$true] %s44_s11 }
   0xf   :  { %s413_s12 = scalar_lea.vmem %s22_s9, 64  ;;  %p418_p6 = scmp.lt.s32.totalorder %s22_s9, %s22_s9 }
  0x10   :  { %p414_p5 = scmp.ne.s32.totalorder %s22_s9, %s413_s12  ;;  %p419_p7 = scmp.lt.s32.totalorder %s413_s12, %s413_s12 }
  0x12   :  { %p420_p8 = por %p419_p7, %p418_p6 }
  0x14   :  { %p421_p9 = pnand %p420_p8, %p414_p5 }
  0x16   :  { %424 = shalt.err (!%p421_p9)
}
  0x17   :  { %24 = dma.hbm_to_vmem [thread:$0]  %s521_s0, 64, %s22_s9, [#allocation4]  }
  0x18   :  { %s433_s15 = scalar_lea.vmem %s45_s11, 1536  ;;  %p438_p11 = scmp.lt.s32.totalorder %s45_s11, %s45_s11 }
  0x19   :  { %p434_p10 = scmp.ne.s32.totalorder %s45_s11, %s433_s15  ;;  %p439_p12 = scmp.lt.s32.totalorder %s433_s15, %s433_s15 }
  0x1b   :  { %p440_p13 = por %p439_p12, %p438_p11 }
  0x1d   :  { %p441_p0 = pnand %p440_p13, %p434_p10 }
  0x1f   :  { %444 = shalt.err (!%p441_p0)
}
  0x20   :  { %s454_s1 = smov 64   ;;  %s455_s16 = smov 4  }
  0x21   :  { %50 = dma.hbm_to_vmem [thread:$0]  %s524_s3, 1536, %s45_s11, [#allocation6], %s454_s1, %s454_s1, %s455_s16  }
  0x22   :  { %445 = dma.done.wait [#allocation4], 64  }
  0x23   :  { %446 = vsyncadd [#allocation4], 4294967232 }
  0x24   :  { %447 = dma.done.wait [#allocation6], 2304  }
  0x25   :  { %448 = vsyncadd [#allocation6], 4294964992  ;;  %v456_v0 = vmov 0   ;;  %v364_v1 = vld [vmem:[#allocation5 + $0x24] ss:$8 sps:$4 sm:$0xff]   ;;  %vm116_vm0 = vcmask 392192   ;;  %v76_v20 = vlaneseq  ;;  %v324_v46 = vstv %s527_s6 }
  0x26   :  { %152 = vmatprep.mubr.bf16.mxu0 %v456_v0  ;;  %272 = vmatprep.subr.bf16.mxu1 %v456_v0  ;;  %v366_v2 = vld [vmem:[#allocation5 + $0x20] ss:$8 sps:$4 sm:$0xff]   ;;  %v367_v3 = vld [vmem:[#allocation5 + $0x14] ss:$8 sps:$4 sm:$0xff]   ;;  %v369_v4 = vld [vmem:[#allocation5 + $0x10] ss:$8 sps:$4 sm:$0xff]  }
  0x27   :  { %130 = vmatprep.subr.bf16.mxu0 %v364_v1  ;;  %v370_v5 = vld [vmem:[#allocation5 + $0x4] ss:$8 sps:$4 sm:$0xff]   ;;  %v372_v7 = vld [vmem:[#allocation5] ss:$8 sps:$4 sm:$0xff]   ;;  %v67_v9 = vld [vmem:[#allocation3] sm:$0xf] }
  0x28   :  { %131 = vmatpush1.bf16.msra.mxu0 %v366_v2  ;;  %v373_v6 = vld [vmem:[#allocation7 + $0x38] sm:$0xff]   ;;  %v374_v8 = vld [vmem:[#allocation7 + $0x30] sm:$0xff]   ;;  %v375_v10 = vld [vmem:[#allocation7 + $0x28] sm:$0xff]   ;;  %v77_v21 = vshrl.u32 %v76_v20, 7  ;;  %vm268_vm1 = vcmask 523264   ;;  %vm326_vm2 = vcmask 7168  }
  0x29   :  { %132 = vmatprep.subr.bf16.mxu0 %v367_v3  ;;  %273 = vmatpush1.bf16.msra.mxu1 %v373_v6  ;;  %v376_v11 = vld [vmem:[#allocation7 + $0x20] sm:$0xff]   ;;  %v377_v12 = vld [vmem:[#allocation7 + $0x18] sm:$0xff]   ;;  %v378_v13 = vld [vmem:[#allocation7 + $0x10] sm:$0xff]  }
  0x2a   :  { %274 = vmatprep.subr.bf16.mxu1 %v456_v0  ;;  %v379_v14 = vld [vmem:[#allocation7 + $0x8] sm:$0xff]   ;;  %v380_v15 = vld [vmem:[#allocation7] sm:$0xff]   ;;  %v381_v16 = vld [vmem:[#allocation7 + $0x58] sm:$0xff]   ;;  %v78_v22 = vsub.s32 0, %v77_v21  ;;  %v82_v24 = vsub.s32 1, %v77_v21 }
  0x2b   :  { %v382_v17 = vld [vmem:[#allocation7 + $0x50] sm:$0xff]   ;;  %v383_v18 = vld [vmem:[#allocation7 + $0x48] sm:$0xff]   ;;  %v384_v19 = vld [vmem:[#allocation7 + $0x40] sm:$0xff]  }
  0x2c   :  { %133 = vmatpush1.bf16.msra.mxu0 %v369_v4  ;;  %v74_v23 = vld [vmem:[%s523_s2] sm:$0x3] }
  0x2d   :  { %134 = vmatprep.subr.bf16.mxu0 %v370_v5  ;;  %275 = vmatpush1.bf16.msra.mxu1 %v374_v8  ;;  %v79_v25 = vrot.slane %v74_v23, %v78_v22  ;;  %v83_v26 = vrot.slane %v74_v23, %v82_v24  ;;  %v341_v37 = vld [vmem:[%s525_s4] ss:$0 sm:$0xff] }
  0x2e   :  { %276 = vmatprep.subr.bf16.mxu1 %v456_v0  ;;  %v355_v41 = vld [vmem:[%s526_s5] ss:$0 sm:$0xff] }
  0x30   :  { %135 = vmatpush1.bf16.msra.mxu0 %v372_v7 }
  0x31   :  { %277 = vmatpush1.bf16.msra.mxu1 %v375_v10 }
  0x32   :  { %278 = vmatprep.subr.bf16.mxu1 %v456_v0 }
  0x33   :  { %340 = vmatmul.mubr.msk.bf16.vlgmr.msra.gmra.mxu0 %vm116_vm0, %v67_v9 }
  0x35   :  { %279 = vmatpush1.bf16.msra.mxu1 %v376_v11 }
  0x36   :  { %280 = vmatprep.subr.bf16.mxu1 %v456_v0 }
  0x39   :  { %281 = vmatpush1.bf16.msra.mxu1 %v377_v12 }
  0x3a   :  { %282 = vmatprep.subr.bf16.mxu1 %v456_v0 }
  0x3d   :  { %283 = vmatpush1.bf16.msra.mxu1 %v378_v13 }
  0x3e   :  { %284 = vmatprep.subr.bf16.mxu1 %v456_v0 }
  0x41   :  { %285 = vmatpush1.bf16.msra.mxu1 %v379_v14 }
  0x42   :  { %286 = vmatprep.subr.bf16.mxu1 %v456_v0 }
  0x45   :  { %287 = vmatpush1.bf16.msra.mxu1 %v380_v15 }
  0x46   :  { %296 = vmatprep.subr.bf16.mxu1 %v456_v0 }
  0x49   :  { %297 = vmatpush2.bf16.msra.mxu1 %v381_v16 }
  0x4a   :  { %298 = vmatprep.subr.bf16.mxu1 %v456_v0 }
  0x4d   :  { %299 = vmatpush2.bf16.msra.mxu1 %v382_v17 }
  0x4e   :  { %300 = vmatprep.subr.bf16.mxu1 %v456_v0 }
  0x51   :  { %301 = vmatpush2.bf16.msra.mxu1 %v383_v18 }
  0x52   :  { %302 = vmatprep.subr.bf16.mxu1 %v456_v0 }
  0x55   :  { %303 = vmatpush2.bf16.msra.mxu1 %v384_v19 }
  0xf3   :  { %v154_v27 = vpop.f32.mrf.mxu0 }
  0xf4   :  { %v155_v28 = vadd.f32 %v154_v27, %v79_v25 }
  0xf5   :  { %v156_v29 = vpop.f32.mrf.mxu0 }
  0xf6   :  { %v157_v30 = vadd.f32 %v156_v29, %v83_v26  ;;  %v161_v31 = vmax.f32 %v155_v28, 0.0 }
  0xf7   :  { %v158_v32 = vpop.f32.mrf.mxu0 }
  0xf8   :  { %v162_v33 = vmax.f32 %v157_v30, 0.0  ;;  %v163_v36 = vpack.c.bf16 %v161_v31, %v161_v31 }
  0xf9   :  { %v159_v34 = vpop.f32.mrf.mxu0 }
  0xfa   :  { %v164_v35 = vpack.c.bf16 %v162_v33, %v162_v33 }
  0xfc   :  { %354 = vmatprep.mubr.msk.bf16.mxu1 %vm268_vm1, %v164_v35 }
  0xfd   :  { %305 = vmatmul.mubr.bf16.vlgmr.msra.gmra.mxu1 %v163_v36 }
 0x1bd   :  { %v306_v38 = vpop.f32.mrf.mxu1 }
 0x1be   :  { %v307_v39 = vadd.f32 %v341_v37, %v306_v38 }
 0x1bf   :  { %v308_v40 = vpop.f32.mrf.mxu1 }
 0x1c0   :  { %v312_v42 = vmax.f32 %v307_v39, 0.0 }
 0x1c1   :  { %v309_v43 = vpop.f32.mrf.mxu1 }
 0x1c2   :  { %v320_v44 = vmul.f32 %v355_v41, %v312_v42 }
 0x1c3   :  { %v310_v45 = vpop.f32.mrf.mxu1 }
 0x1c4   :  { %321 = vadd.xlane.f32.xlu0 %v320_v44 }
 0x24d   :  { %v322_v47 = vpop.xlane.xlu0 %321 }
 0x24e   :  { %v325_v48 = vadd.f32 %v324_v46, %v322_v47 }
 0x250   :  { %327 = vst.msk [vmem:[%s528_s7] sm:$0xff] %vm326_vm2, %v325_v48 }
 0x251   :  { %332 = vsyncpa [#allocation4], 1 }
 0x252   :  { %333 = vsyncpa [#allocation6], 1 }

</bundles_post_ra>
